<compile_context>
chip_gen: v6e
topology: v6e:2x2x1
jax: 0.10.0
libtpu: 0.0.40
codegen_flags: <defaults>
</compile_context>

<pallas_src>
import functools

import jax
import jax.numpy as jnp
import numpy as np
from jax.experimental import pallas as pl
from jax.experimental.pallas import tpu as pltpu


def _stockmixer_loss_kernel(p_ref, g_ref, b_ref, m_ref, out_ref, *, n_stocks):
    p = p_ref[...]                               # (1, Np) predictions   (lane = stock)
    g = g_ref[...]                               # (1, Np) ground truth
    b = b_ref[...]                               # (1, Np) base price    (padded lanes = 1)
    m = m_ref[...]                               # (1, Np) mask          (padded lanes = 0)
    n_pad = p.shape[1]

    # predicted_returns = (predictions - base_price) / base_price
    pr = (p - b) / b                             # (1, Np)

    # --- regression loss: MSE over the original (N, 1) tensors => divide by N ---
    diff = (pr - g) * m                          # padded lanes are exactly 0
    reg = jnp.sum(diff * diff, keepdims=True) / float(n_stocks)          # (1, 1)

    # --- column-layout (stock-along-sublane) copies of pr and g -----------------
    # Exact lane -> sublane move via iota-select + lane reduce: no second DMA,
    # no materialized transpose, no pad-value sentinel, bit-exact values.
    ii = jax.lax.broadcasted_iota(jnp.int32, (n_pad, n_pad), 0)   # row index i
    jj = jax.lax.broadcasted_iota(jnp.int32, (n_pad, n_pad), 1)   # col index j
    diag = ii == jj
    pr_col = jnp.sum(jnp.where(diag, pr, 0.0), axis=1, keepdims=True)    # (Np, 1) = pr_i
    g_col = jnp.sum(jnp.where(diag, g, 0.0), axis=1, keepdims=True)      # (Np, 1) = g_i

    # --- pairwise ranking loss ---------------------------------------------------
    # relu[i, j] = max(-(pr_i - pr_j)(g_i - g_j), 0) = max((pr_j - pr_i)(g_i - g_j), 0)
    relu_term = jnp.maximum((pr - pr_col) * (g_col - g), 0.0)            # (Np, Np)
    if n_pad > n_stocks:
        # Drop padded rows i only.  Real-but-masked stocks still contribute as
        # index i, exactly like the torch broadcast (the mask only enters as
        # m_j * m_k).  Static Python branch: no cost when N is a multiple of 128.
        relu_term = jnp.where(ii < n_stocks, relu_term, 0.0)

    # torch's (N, N, N)-broadcast mean, factored exactly:
    #   rank = (sum_j m_j * sum_i relu[i, j]) * (sum_k m_k) / N^3
    col_sums = jnp.sum(relu_term, axis=0, keepdims=True)                 # (1, Np)
    num = jnp.sum(col_sums * m, keepdims=True)                           # (1, 1)
    rank = num * jnp.sum(m, keepdims=True) / float(n_stocks) ** 3        # (1, 1)

    # Fused (8, 128) output, full-tile (unmasked) store: lane 0 = reg, lane 1 = rank.
    lane = jax.lax.broadcasted_iota(jnp.int32, out_ref.shape, 1)
    out_ref[...] = jnp.where(lane == 0, reg, jnp.where(lane == 1, rank, 0.0))


def _stockmixer_loss_impl(predictions, ground_truth, base_price, mask, alpha):
    n = predictions.shape[0]
    n_pad = ((n + 127) // 128) * 128             # lane-dense stock dimension

    def row(x, pad_value=0.0):
        r = x.astype(jnp.float32).reshape(1, n)  # (N,1)->(1,N): layout-trivial
        if n_pad > n:
            r = jnp.pad(r, ((0, 0), (0, n_pad - n)), constant_values=pad_value)
        return r

    if mask is None:
        mask = jnp.ones((n, 1), jnp.float32)

    p = row(predictions)
    g = row(ground_truth)
    b = row(base_price, pad_value=1.0)           # keeps the divide finite on pad lanes
    m = row(mask)                                # pad lanes drop out of every sum

    compiler_params = None
    if n_pad > 1024:
        # The whole-array (Np, Np) path outgrows the default *scoped* VMEM limit
        # (16 MiB v5e, 32 MiB v6e/v7x) well before physical VMEM; raise it for
        # mid-size N.  Beyond a few K stocks use the tiled path (TODO below).
        est = 6 * n_pad * n_pad * 4 + (4 << 20)
        compiler_params = pltpu.CompilerParams(vmem_limit_bytes=int(min(est, 120 << 20)))

    out = pl.pallas_call(
        functools.partial(_stockmixer_loss_kernel, n_stocks=n),
        in_specs=[pl.BlockSpec(memory_space=pltpu.MemorySpace.VMEM)] * 4,
        out_specs=pl.BlockSpec(memory_space=pltpu.MemorySpace.VMEM),
        out_shape=jax.ShapeDtypeStruct((8, 128), jnp.float32),
        compiler_params=compiler_params,
    )(p, g, b, m)
    # TODO(synk): for N >~ 1-1.5K on v7x (64 MiB VMEM) / ~2-3K on v5e/v6e, tile the
    # (Np, Np) pairwise block over a leading "parallel" lane-strip grid axis with a
    # VMEM scratch accumulator (pl.when init/finalize) so both v7x TensorCores split
    # the VALU-bound work and VMEM stays bounded.

    reg = out[0, 0]
    rank = out[0, 1]
    total = reg + jnp.asarray(alpha, jnp.float32) * rank   # fused epilogue; alpha stays dynamic
    return total, reg, rank


_stockmixer_loss_jit = jax.jit(_stockmixer_loss_impl)


def stockmixer_loss(predictions, ground_truth, base_price, mask=None, alpha=0.1):
    """Mirrors StockMixerLoss.forward: returns (total_loss, reg_loss, rank_loss)."""
    return _stockmixer_loss_jit(predictions, ground_truth, base_price, mask, alpha)


def _ref_loss(pred, gt, base, mask, alpha=0.1):
    """Pure-JAX reference that mirrors the PyTorch code line by line."""
    pr = (pred - base) / base
    reg = jnp.mean((pr * mask - gt * mask) ** 2)
    pre_pw = pr[:, None, :] - pr[None, :, :]        # (N, N, 1)
    gt_pw = gt[:, None, :] - gt[None, :, :]         # (N, N, 1)
    mask_pw = mask @ mask.T                         # (N, N)
    rank = jnp.mean(jax.nn.relu(-pre_pw * gt_pw) * mask_pw)   # broadcasts to (N, N, N)
    return reg + alpha * rank, reg, rank


if __name__ == "__main__":
    alpha = 0.1
    for n_stocks in (128, 96):   # 96 exercises the lane-padding / valid-row path
        key = jax.random.PRNGKey(0)
        k_base, k_pred, k_gt, k_mask = jax.random.split(key, 4)

        base_price = jax.random.uniform(k_base, (n_stocks, 1), jnp.float32, 0.5, 2.0)
        predictions = base_price * (1.0 + 0.05 * jax.random.normal(k_pred, (n_stocks, 1), jnp.float32))
        ground_truth = 0.05 * jax.random.normal(k_gt, (n_stocks, 1), jnp.float32)
        mask = (jax.random.uniform(k_mask, (n_stocks, 1), jnp.float32) < 0.9).astype(jnp.float32)

        total, reg, rank = stockmixer_loss(predictions, ground_truth, base_price, mask, alpha)
        jax.block_until_ready((total, reg, rank))

        ref_total, ref_reg, ref_rank = _ref_loss(predictions, ground_truth, base_price, mask, alpha)
        jax.block_until_ready((ref_total, ref_reg, ref_rank))

        assert np.allclose(np.asarray(reg), np.asarray(ref_reg), rtol=1e-4, atol=1e-6), (n_stocks, reg, ref_reg)
        assert np.allclose(np.asarray(rank), np.asarray(ref_rank), rtol=1e-4, atol=1e-6), (n_stocks, rank, ref_rank)
        assert np.allclose(np.asarray(total), np.asarray(ref_total), rtol=1e-4, atol=1e-6), (n_stocks, total, ref_total)

    print("KERNEL_OK")
</pallas_src>

<mosaic_0001>
module attributes {stable_mosaic.version = 11 : i64} {
  func.func @_stockmixer_loss_kernel(%arg0: memref<1x128xf32, #tpu.memory_space<vmem>>, %arg1: memref<1x128xf32, #tpu.memory_space<vmem>>, %arg2: memref<1x128xf32, #tpu.memory_space<vmem>>, %arg3: memref<1x128xf32, #tpu.memory_space<vmem>>, %arg4: memref<8x128xf32, #tpu.memory_space<vmem>>) attributes {dimension_semantics = [], scalar_prefetch = 0 : i64, scratch_operands = 0 : i64, tpu.core_type = #tpu.core_type<tc>} {
    %c0 = arith.constant 0 : index
    %c0_0 = arith.constant 0 : index
    %0 = vector.load %arg0[%c0, %c0_0] : memref<1x128xf32, #tpu.memory_space<vmem>>, vector<1x128xf32>
    %c0_1 = arith.constant 0 : index
    %c0_2 = arith.constant 0 : index
    %1 = vector.load %arg1[%c0_1, %c0_2] : memref<1x128xf32, #tpu.memory_space<vmem>>, vector<1x128xf32>
    %c0_3 = arith.constant 0 : index
    %c0_4 = arith.constant 0 : index
    %2 = vector.load %arg2[%c0_3, %c0_4] : memref<1x128xf32, #tpu.memory_space<vmem>>, vector<1x128xf32>
    %c0_5 = arith.constant 0 : index
    %c0_6 = arith.constant 0 : index
    %3 = vector.load %arg3[%c0_5, %c0_6] : memref<1x128xf32, #tpu.memory_space<vmem>>, vector<1x128xf32>
    %4 = arith.subf %0, %2 : vector<1x128xf32>
    %5 = arith.divf %4, %2 : vector<1x128xf32>
    %6 = arith.subf %5, %1 : vector<1x128xf32>
    %7 = arith.mulf %6, %3 : vector<1x128xf32>
    %8 = arith.mulf %7, %7 : vector<1x128xf32>
    %9 = vector.shape_cast %8 : vector<1x128xf32> to vector<1x1x128xf32>
    %cst = arith.constant dense<0.000000e+00> : vector<1xf32>
    %10 = vector.multi_reduction <add>, %9, %cst [1, 2] : vector<1x1x128xf32> to vector<1xf32>
    %11 = vector.shape_cast %10 : vector<1xf32> to vector<1x1x1xf32>
    %12 = vector.extract %11[0, 0, 0] : f32 from vector<1x1x1xf32>
    %13 = vector.broadcast %12 : f32 to vector<1x1xf32>
    %cst_7 = arith.constant 1.280000e+02 : f32
    %14 = vector.broadcast %cst_7 : f32 to vector<1x1xf32>
    %15 = arith.divf %13, %14 : vector<1x1xf32>
    %16 = tpu.iota {dimensions = array<i32: 0>} : vector<128x128xi32>
    %17 = tpu.iota {dimensions = array<i32: 1>} : vector<128x128xi32>
    %18 = arith.cmpi eq, %16, %17 : vector<128x128xi32>
    %cst_8 = arith.constant 0.000000e+00 : f32
    %19 = vector.shape_cast %5 : vector<1x128xf32> to vector<1x128xf32>
    %20 = vector.broadcast %19 : vector<1x128xf32> to vector<128x128xf32>
    %21 = vector.broadcast %cst_8 : f32 to vector<128x128xf32>
    %22 = arith.select %18, %20, %21 : vector<128x128xi1>, vector<128x128xf32>
    %cst_9 = arith.constant dense<0.000000e+00> : vector<128xf32>
    %23 = vector.multi_reduction <add>, %22, %cst_9 [1] : vector<128x128xf32> to vector<128xf32>
    %24 = vector.shape_cast %23 : vector<128xf32> to vector<128x1xf32>
    %cst_10 = arith.constant 0.000000e+00 : f32
    %25 = vector.shape_cast %1 : vector<1x128xf32> to vector<1x128xf32>
    %26 = vector.broadcast %25 : vector<1x128xf32> to vector<128x128xf32>
    %27 = vector.broadcast %cst_10 : f32 to vector<128x128xf32>
    %28 = arith.select %18, %26, %27 : vector<128x128xi1>, vector<128x128xf32>
    %cst_11 = arith.constant dense<0.000000e+00> : vector<128xf32>
    %29 = vector.multi_reduction <add>, %28, %cst_11 [1] : vector<128x128xf32> to vector<128xf32>
    %30 = vector.shape_cast %29 : vector<128xf32> to vector<128x1xf32>
    %31 = vector.broadcast %5 : vector<1x128xf32> to vector<128x128xf32>
    %32 = vector.broadcast %24 : vector<128x1xf32> to vector<128x128xf32>
    %33 = arith.subf %31, %32 : vector<128x128xf32>
    %34 = vector.broadcast %30 : vector<128x1xf32> to vector<128x128xf32>
    %35 = vector.broadcast %1 : vector<1x128xf32> to vector<128x128xf32>
    %36 = arith.subf %34, %35 : vector<128x128xf32>
    %37 = arith.mulf %33, %36 : vector<128x128xf32>
    %cst_12 = arith.constant 0.000000e+00 : f32
    %38 = vector.broadcast %cst_12 : f32 to vector<128x128xf32>
    %39 = arith.maximumf %37, %38 : vector<128x128xf32>
    %cst_13 = arith.constant dense<0.000000e+00> : vector<128xf32>
    %40 = vector.multi_reduction <add>, %39, %cst_13 [0] : vector<128x128xf32> to vector<128xf32>
    %41 = vector.shape_cast %40 : vector<128xf32> to vector<1x128xf32>
    %42 = arith.mulf %41, %3 : vector<1x128xf32>
    %43 = vector.shape_cast %42 : vector<1x128xf32> to vector<1x1x128xf32>
    %cst_14 = arith.constant dense<0.000000e+00> : vector<1xf32>
    %44 = vector.multi_reduction <add>, %43, %cst_14 [1, 2] : vector<1x1x128xf32> to vector<1xf32>
    %45 = vector.shape_cast %44 : vector<1xf32> to vector<1x1x1xf32>
    %46 = vector.extract %45[0, 0, 0] : f32 from vector<1x1x1xf32>
    %47 = vector.broadcast %46 : f32 to vector<1x1xf32>
    %48 = vector.shape_cast %3 : vector<1x128xf32> to vector<1x1x128xf32>
    %cst_15 = arith.constant dense<0.000000e+00> : vector<1xf32>
    %49 = vector.multi_reduction <add>, %48, %cst_15 [1, 2] : vector<1x1x128xf32> to vector<1xf32>
    %50 = vector.shape_cast %49 : vector<1xf32> to vector<1x1x1xf32>
    %51 = vector.extract %50[0, 0, 0] : f32 from vector<1x1x1xf32>
    %52 = vector.broadcast %51 : f32 to vector<1x1xf32>
    %53 = arith.mulf %47, %52 : vector<1x1xf32>
    %cst_16 = arith.constant 0x4A000000 : f32
    %54 = vector.broadcast %cst_16 : f32 to vector<1x1xf32>
    %55 = arith.divf %53, %54 : vector<1x1xf32>
    %56 = tpu.iota {dimensions = array<i32: 1>} : vector<8x128xi32>
    %c0_i32 = arith.constant 0 : i32
    %57 = vector.broadcast %c0_i32 : i32 to vector<8x128xi32>
    %58 = arith.cmpi eq, %56, %57 : vector<8x128xi32>
    %c1_i32 = arith.constant 1 : i32
    %59 = vector.broadcast %c1_i32 : i32 to vector<8x128xi32>
    %60 = arith.cmpi eq, %56, %59 : vector<8x128xi32>
    %cst_17 = arith.constant 0.000000e+00 : f32
    %61 = vector.shape_cast %55 : vector<1x1xf32> to vector<1x1xf32>
    %62 = vector.broadcast %61 : vector<1x1xf32> to vector<8x128xf32>
    %63 = vector.broadcast %cst_17 : f32 to vector<8x128xf32>
    %64 = arith.select %60, %62, %63 : vector<8x128xi1>, vector<8x128xf32>
    %65 = vector.shape_cast %15 : vector<1x1xf32> to vector<1x1xf32>
    %66 = vector.broadcast %65 : vector<1x1xf32> to vector<8x128xf32>
    %67 = arith.select %58, %66, %64 : vector<8x128xi1>, vector<8x128xf32>
    %c0_18 = arith.constant 0 : index
    %c0_19 = arith.constant 0 : index
    %68 = vector.load %arg4[%c0_18, %c0_19] : memref<8x128xf32, #tpu.memory_space<vmem>>, vector<8x128xf32>
    tpu.vector_store %arg4[%c0_18, %c0_19], %67 {strides = array<i32>} : memref<8x128xf32, #tpu.memory_space<vmem>>, vector<8x128xf32>,
    return
  }
}

</mosaic_0001>

<bundles_post_ra>
// kernel: _stockmixer_loss_impl.1
= control target key start
LH: loop header
LB: loop body
LE: loop exit
PB: predicated region body
PF: predicated region fallthrough
CT: control target
= control target key end

     0   :  { %v41_v0 = vlaneseq  ;;  %s533_s1 = inlined_call_operand.vmem [shape: f32[1,128], index: 1, kind: input, shape index: {}]   ;;  %s534_s2 = inlined_call_operand.vmem [shape: f32[1,128], index: 2, kind: input, shape index: {}]   ;;  %s535_s0 = inlined_call_operand.vmem [shape: f32[1,128], index: 0, kind: input, shape index: {}]   ;;  %s536_s3 = inlined_call_operand.vmem [shape: f32[1,128], index: 3, kind: input, shape index: {}]   ;;  %s537_s4 = inlined_call_operand.vmem [shape: f32[8,128], index: 4, kind: output, shape index: {}]  }
   0x1   :  { %v19_v1 = vld [vmem:[%s534_s2] sm:$0x1] }
   0x2   :  { %310 = vrcp.f32 %v19_v1  ;;  %v340_v2 = vshrl.u32 %v41_v0, 7  ;;  %v342_v3 = vand.u32 127, %v41_v0  ;;  %v347_v4 = vld [vmem:[%s533_s1] sm:$0x1] }
   0x3   :  { %v17_v10 = vld [vmem:[%s535_s0] sm:$0x1] }
   0x4   :  { %v79_v5 = vsub.s32 0, %v340_v2  ;;  %v43_v6 = vadd.s32 8, %v340_v2  ;;  %vm60_vm0 = vcmp.eq.s32.totalorder %v340_v2, %v342_v3  ;;  %v44_v8 = vadd.s32 16, %v340_v2  ;;  %v488_v60 = vld [vmem:[%s536_s3] sm:$0x1] }
   0x5   :  { %v45_v12 = vadd.s32 24, %v340_v2  ;;  %v21_v13 = vsub.f32 %v17_v10, %v19_v1  ;;  %v46_v16 = vadd.s32 32, %v340_v2  ;;  %v47_v20 = vadd.s32 40, %v340_v2 }
   0x6   :  { %v354_v7 = vrot.slane %v347_v4, %v79_v5  ;;  %vm61_vm1 = vcmp.eq.s32.totalorder %v43_v6, %v342_v3  ;;  %vm62_vm2 = vcmp.eq.s32.totalorder %v44_v8, %v342_v3  ;;  %v48_v24 = vadd.s32 48, %v340_v2 }
   0x7   :  { %vm63_vm3 = vcmp.eq.s32.totalorder %v45_v12, %v342_v3  ;;  %vm64_vm4 = vcmp.eq.s32.totalorder %v46_v16, %v342_v3  ;;  %vm65_vm5 = vcmp.eq.s32.totalorder %v47_v20, %v342_v3  ;;  %v49_v27 = vadd.s32 56, %v340_v2 }
   0x8   :  { %v136_v9 = vsel %vm60_vm0, %v354_v7, 0.0  ;;  %v137_v11 = vsel %vm61_vm1, %v354_v7, 0.0  ;;  %v138_v14 = vsel %vm62_vm2, %v354_v7, 0.0  ;;  %v139_v19 = vsel %vm63_vm3, %v354_v7, 0.0 }
   0x9   :  { %152 = vadd.xlane.f32.xlu1 %v136_v9  ;;  %v140_v23 = vsel %vm64_vm4, %v354_v7, 0.0  ;;  %v141_v26 = vsel %vm65_vm5, %v354_v7, 0.0  ;;  %vm66_vm6 = vcmp.eq.s32.totalorder %v48_v24, %v342_v3  ;;  %vm67_vm7 = vcmp.eq.s32.totalorder %v49_v27, %v342_v3 }
   0xa   :  { %v142_v29 = vsel %vm66_vm6, %v354_v7, 0.0  ;;  %v50_v30 = vadd.s32 64, %v340_v2  ;;  %v143_v32 = vsel %vm67_vm7, %v354_v7, 0.0  ;;  %v51_v33 = vadd.s32 72, %v340_v2 }
   0xb   :  { %v52_v36 = vadd.s32 80, %v340_v2  ;;  %v53_v39 = vadd.s32 88, %v340_v2  ;;  %v54_v42 = vadd.s32 96, %v340_v2  ;;  %v55_v45 = vadd.s32 104, %v340_v2 }
   0xc   :  { %vm68_vm8 = vcmp.eq.s32.totalorder %v50_v30, %v342_v3  ;;  %vm69_vm9 = vcmp.eq.s32.totalorder %v51_v33, %v342_v3  ;;  %v56_v48 = vadd.s32 112, %v340_v2  ;;  %v57_v51 = vadd.s32 120, %v340_v2 }
   0xd   :  { %154 = vadd.xlane.f32.xlu1 %v137_v11  ;;  %v144_v35 = vsel %vm68_vm8, %v354_v7, 0.0  ;;  %v145_v38 = vsel %vm69_vm9, %v354_v7, 0.0  ;;  %vm70_vm10 = vcmp.eq.s32.totalorder %v52_v36, %v342_v3  ;;  %vm71_vm11 = vcmp.eq.s32.totalorder %v53_v39, %v342_v3 }
   0xe   :  { %v146_v41 = vsel %vm70_vm10, %v354_v7, 0.0  ;;  %v147_v44 = vsel %vm71_vm11, %v354_v7, 0.0  ;;  %vm72_vm12 = vcmp.eq.s32.totalorder %v54_v42, %v342_v3  ;;  %vm73_vm13 = vcmp.eq.s32.totalorder %v55_v45, %v342_v3 }
   0xf   :  { %v311_v15 = vpop.eup %310  ;;  %v148_v47 = vsel %vm72_vm12, %v354_v7, 0.0  ;;  %v149_v50 = vsel %vm73_vm13, %v354_v7, 0.0  ;;  %vm74_vm14 = vcmp.eq.s32.totalorder %v56_v48, %v342_v3  ;;  %vm75_vm15 = vcmp.eq.s32.totalorder %v57_v51, %v342_v3 }
  0x10   :  { %v375_v17 = vmul.f32 %v311_v15, %v21_v13  ;;  %v150_v53 = vsel %vm74_vm14, %v354_v7, 0.0  ;;  %v151_v55 = vsel %vm75_vm15, %v354_v7, 0.0 }
  0x11   :  { %156 = vadd.xlane.f32.xlu1 %v138_v14 }
  0x12   :  { %v378_v18 = vrot.slane %v375_v17, %v79_v5  ;;  %v24_v59 = vsub.f32 %v375_v17, %v347_v4 }
  0x14   :  { %v82_v21 = vsel %vm60_vm0, %v378_v18, 0.0  ;;  %v83_v22 = vsel %vm61_vm1, %v378_v18, 0.0  ;;  %v84_v25 = vsel %vm62_vm2, %v378_v18, 0.0  ;;  %v85_v28 = vsel %vm63_vm3, %v378_v18, 0.0 }
  0x15   :  { %98 = vadd.xlane.f32.xlu0 %v82_v21  ;;  %158 = vadd.xlane.f32.xlu1 %v139_v19  ;;  %v86_v31 = vsel %vm64_vm4, %v378_v18, 0.0  ;;  %v87_v34 = vsel %vm65_vm5, %v378_v18, 0.0  ;;  %v88_v37 = vsel %vm66_vm6, %v378_v18, 0.0  ;;  %v89_v40 = vsel %vm67_vm7, %v378_v18, 0.0 }
  0x16   :  { %v90_v43 = vsel %vm68_vm8, %v378_v18, 0.0  ;;  %v91_v46 = vsel %vm69_vm9, %v378_v18, 0.0  ;;  %v92_v49 = vsel %vm70_vm10, %v378_v18, 0.0  ;;  %v93_v52 = vsel %vm71_vm11, %v378_v18, 0.0 }
  0x17   :  { %v94_v54 = vsel %vm72_vm12, %v378_v18, 0.0  ;;  %v95_v56 = vsel %vm73_vm13, %v378_v18, 0.0  ;;  %v96_v57 = vsel %vm74_vm14, %v378_v18, 0.0  ;;  %v97_v58 = vsel %vm75_vm15, %v378_v18, 0.0 }
  0x18   :  { %v25_v61 = vmul.f32 %v24_v59, %v488_v60  ;;  %vm27_vm0 = vcmask 1040384   ;;  %vm296_vm1 = vcmp.eq.s32.totalorder %v342_v3, 1  ;;  %vm295_vm2 = vcmp.eq.s32.totalorder %v342_v3, 0 }
  0x19   :  { %100 = vadd.xlane.f32.xlu0 %v83_v22  ;;  %160 = vadd.xlane.f32.xlu1 %v140_v23  ;;  %v281_v0 = vsel %vm27_vm0, %v488_v60, 0.0 }
  0x1a   :  { %v26_v62 = vmul.f32 %v25_v61, %v25_v61 }
  0x1c   :  { %v28_v63 = vsel %vm27_vm0, %v26_v62, 0.0 }
  0x1d   :  { %102 = vadd.xlane.f32.xlu0 %v84_v25  ;;  %162 = vadd.xlane.f32.xlu1 %v141_v26 }
  0x21   :  { %104 = vadd.xlane.f32.xlu0 %v85_v28  ;;  %164 = vadd.xlane.f32.xlu1 %v142_v29 }
  0x25   :  { %106 = vadd.xlane.f32.xlu0 %v86_v31  ;;  %166 = vadd.xlane.f32.xlu1 %v143_v32 }
  0x29   :  { %108 = vadd.xlane.f32.xlu0 %v87_v34  ;;  %168 = vadd.xlane.f32.xlu1 %v144_v35 }
  0x2d   :  { %110 = vadd.xlane.f32.xlu0 %v88_v37  ;;  %170 = vadd.xlane.f32.xlu1 %v145_v38 }
  0x31   :  { %112 = vadd.xlane.f32.xlu0 %v89_v40  ;;  %172 = vadd.xlane.f32.xlu1 %v146_v41 }
  0x35   :  { %114 = vadd.xlane.f32.xlu0 %v90_v43  ;;  %174 = vadd.xlane.f32.xlu1 %v147_v44 }
  0x39   :  { %116 = vadd.xlane.f32.xlu0 %v91_v46  ;;  %176 = vadd.xlane.f32.xlu1 %v148_v47 }
  0x3d   :  { %118 = vadd.xlane.f32.xlu0 %v92_v49  ;;  %178 = vadd.xlane.f32.xlu1 %v149_v50 }
  0x41   :  { %120 = vadd.xlane.f32.xlu0 %v93_v52  ;;  %180 = vadd.xlane.f32.xlu1 %v150_v53 }
  0x45   :  { %122 = vadd.xlane.f32.xlu0 %v94_v54  ;;  %182 = vadd.xlane.f32.xlu1 %v151_v55 }
  0x49   :  { %124 = vadd.xlane.f32.xlu0 %v95_v56 }
  0x4d   :  { %126 = vadd.xlane.f32.xlu0 %v96_v57 }
  0x51   :  { %128 = vadd.xlane.f32.xlu0 %v97_v58 }
  0x55   :  { %29 = vadd.xlane.f32.xlu0 %v28_v63 }
  0x59   :  { %282 = vadd.xlane.f32.xlu0 %v281_v0 }
  0x92   :  { %v153_v1 = vpop.xlane.xlu1 %152 }
  0x93   :  { %v200_v23 = vsub.f32 %v153_v1, %v354_v7 }
  0x96   :  { %v155_v2 = vpop.xlane.xlu1 %154 }
  0x97   :  { %v201_v21 = vsub.f32 %v155_v2, %v354_v7 }
  0x9a   :  { %v157_v5 = vpop.xlane.xlu1 %156 }
  0x9b   :  { %v202_v25 = vsub.f32 %v157_v5, %v354_v7 }
  0x9e   :  { %v99_v4 = vpop.xlane.xlu0 %98  ;;  %v159_v6 = vpop.xlane.xlu1 %158 }
  0x9f   :  { %v184_v24 = vsub.f32 %v378_v18, %v99_v4  ;;  %v203_v30 = vsub.f32 %v159_v6, %v354_v7 }
  0xa1   :  { %v216_v32 = vmul.f32 %v200_v23, %v184_v24 }
  0xa2   :  { %v101_v8 = vpop.xlane.xlu0 %100  ;;  %v161_v9 = vpop.xlane.xlu1 %160 }
  0xa3   :  { %v185_v22 = vsub.f32 %v378_v18, %v101_v8  ;;  %v204_v34 = vsub.f32 %v161_v9, %v354_v7  ;;  %v232_v42 = vmax.f32 %v216_v32, 0.0 }
  0xa5   :  { %v217_v29 = vmul.f32 %v201_v21, %v185_v22 }
  0xa6   :  { %v103_v10 = vpop.xlane.xlu0 %102  ;;  %v163_v11 = vpop.xlane.xlu1 %162 }
  0xa7   :  { %v186_v26 = vsub.f32 %v378_v18, %v103_v10  ;;  %v233_v38 = vmax.f32 %v217_v29, 0.0  ;;  %v205_v40 = vsub.f32 %v163_v11, %v354_v7 }
  0xa9   :  { %v218_v33 = vmul.f32 %v202_v25, %v186_v26  ;;  %v248_v48 = vadd.f32 %v233_v38, %v232_v42 }
  0xaa   :  { %v105_v12 = vpop.xlane.xlu0 %104  ;;  %v165_v13 = vpop.xlane.xlu1 %164 }
  0xab   :  { %v187_v31 = vsub.f32 %v378_v18, %v105_v12  ;;  %v234_v43 = vmax.f32 %v218_v33, 0.0  ;;  %v206_v45 = vsub.f32 %v165_v13, %v354_v7 }
  0xad   :  { %v219_v39 = vmul.f32 %v203_v30, %v187_v31  ;;  %v249_v54 = vadd.f32 %v248_v48, %v234_v43 }
  0xae   :  { %v107_v14 = vpop.xlane.xlu0 %106  ;;  %v167_v15 = vpop.xlane.xlu1 %166 }
  0xaf   :  { %v188_v35 = vsub.f32 %v378_v18, %v107_v14  ;;  %v235_v49 = vmax.f32 %v219_v39, 0.0  ;;  %v207_v52 = vsub.f32 %v167_v15, %v354_v7 }
  0xb1   :  { %v220_v44 = vmul.f32 %v204_v34, %v188_v35  ;;  %v250_v61 = vadd.f32 %v249_v54, %v235_v49 }
  0xb2   :  { %v109_v16 = vpop.xlane.xlu0 %108  ;;  %v169_v17 = vpop.xlane.xlu1 %168 }
  0xb3   :  { %v189_v41 = vsub.f32 %v378_v18, %v109_v16  ;;  %v236_v55 = vmax.f32 %v220_v44, 0.0  ;;  %v208_v58 = vsub.f32 %v169_v17, %v354_v7 }
  0xb5   :  { %v221_v50 = vmul.f32 %v205_v40, %v189_v41  ;;  %v251_v2 = vadd.f32 %v250_v61, %v236_v55 }
  0xb6   :  { %v111_v19 = vpop.xlane.xlu0 %110  ;;  %v171_v20 = vpop.xlane.xlu1 %170 }
  0xb7   :  { %v190_v46 = vsub.f32 %v378_v18, %v111_v19  ;;  %v237_v62 = vmax.f32 %v221_v50, 0.0  ;;  %v209_v0 = vsub.f32 %v171_v20, %v354_v7 }
  0xb9   :  { %v222_v56 = vmul.f32 %v206_v45, %v190_v46  ;;  %v252_v11 = vadd.f32 %v251_v2, %v237_v62 }
  0xba   :  { %v113_v27 = vpop.xlane.xlu0 %112  ;;  %v173_v28 = vpop.xlane.xlu1 %172 }
  0xbb   :  { %v191_v53 = vsub.f32 %v378_v18, %v113_v27  ;;  %v238_v5 = vmax.f32 %v222_v56, 0.0  ;;  %v210_v9 = vsub.f32 %v173_v28, %v354_v7 }
  0xbd   :  { %v223_v63 = vmul.f32 %v207_v52, %v191_v53  ;;  %v253_v16 = vadd.f32 %v252_v11, %v238_v5 }
  0xbe   :  { %v115_v36 = vpop.xlane.xlu0 %114  ;;  %v175_v37 = vpop.xlane.xlu1 %174 }
  0xbf   :  { %v192_v59 = vsub.f32 %v378_v18, %v115_v36  ;;  %v239_v12 = vmax.f32 %v223_v63, 0.0  ;;  %v211_v14 = vsub.f32 %v175_v37, %v354_v7 }
  0xc1   :  { %v224_v8 = vmul.f32 %v208_v58, %v192_v59  ;;  %v254_v24 = vadd.f32 %v253_v16, %v239_v12 }
  0xc2   :  { %v117_v47 = vpop.xlane.xlu0 %116  ;;  %v177_v51 = vpop.xlane.xlu1 %176 }
  0xc3   :  { %v193_v1 = vsub.f32 %v378_v18, %v117_v47  ;;  %v240_v19 = vmax.f32 %v224_v8, 0.0  ;;  %v212_v21 = vsub.f32 %v177_v51, %v354_v7 }
  0xc5   :  { %v225_v13 = vmul.f32 %v209_v0, %v193_v1  ;;  %v255_v29 = vadd.f32 %v254_v24, %v240_v19 }
  0xc6   :  { %v119_v57 = vpop.xlane.xlu0 %118  ;;  %v179_v6 = vpop.xlane.xlu1 %178 }
  0xc7   :  { %v194_v10 = vsub.f32 %v378_v18, %v119_v57  ;;  %v241_v25 = vmax.f32 %v225_v13, 0.0  ;;  %v213_v27 = vsub.f32 %v179_v6, %v354_v7 }
  0xc9   :  { %v226_v20 = vmul.f32 %v210_v9, %v194_v10  ;;  %v256_v33 = vadd.f32 %v255_v29, %v241_v25 }
  0xca   :  { %v121_v4 = vpop.xlane.xlu0 %120  ;;  %v181_v23 = vpop.xlane.xlu1 %180 }
  0xcb   :  { %v195_v15 = vsub.f32 %v378_v18, %v121_v4  ;;  %v242_v30 = vmax.f32 %v226_v20, 0.0  ;;  %v214_v36 = vsub.f32 %v181_v23, %v354_v7 }
  0xcd   :  { %v227_v26 = vmul.f32 %v211_v14, %v195_v15  ;;  %v257_v39 = vadd.f32 %v256_v33, %v242_v30 }
  0xce   :  { %v123_v17 = vpop.xlane.xlu0 %122  ;;  %v183_v38 = vpop.xlane.xlu1 %182 }
  0xcf   :  { %v196_v22 = vsub.f32 %v378_v18, %v123_v17  ;;  %v243_v34 = vmax.f32 %v227_v26, 0.0  ;;  %v215_v45 = vsub.f32 %v183_v38, %v354_v7 }
  0xd1   :  { %v228_v31 = vmul.f32 %v212_v21, %v196_v22  ;;  %v258_v42 = vadd.f32 %v257_v39, %v243_v34 }
  0xd2   :  { %v125_v28 = vpop.xlane.xlu0 %124 }
  0xd3   :  { %v197_v32 = vsub.f32 %v378_v18, %v125_v28  ;;  %v244_v40 = vmax.f32 %v228_v31, 0.0 }
  0xd5   :  { %v229_v35 = vmul.f32 %v213_v27, %v197_v32  ;;  %v259_v47 = vadd.f32 %v258_v42, %v244_v40 }
  0xd6   :  { %v127_v37 = vpop.xlane.xlu0 %126 }
  0xd7   :  { %v198_v41 = vsub.f32 %v378_v18, %v127_v37  ;;  %v245_v43 = vmax.f32 %v229_v35, 0.0 }
  0xd9   :  { %v230_v44 = vmul.f32 %v214_v36, %v198_v41  ;;  %v260_v50 = vadd.f32 %v259_v47, %v245_v43 }
  0xda   :  { %v129_v46 = vpop.xlane.xlu0 %128 }
  0xdb   :  { %v246_v48 = vmax.f32 %v230_v44, 0.0  ;;  %v199_v49 = vsub.f32 %v378_v18, %v129_v46 }
  0xdd   :  { %v231_v51 = vmul.f32 %v215_v45, %v199_v49  ;;  %v261_v52 = vadd.f32 %v260_v50, %v246_v48 }
  0xde   :  { %v30_v63 = vpop.xlane.xlu0 %29 }
  0xdf   :  { %v247_v53 = vmax.f32 %v231_v51, 0.0  ;;  %v31_v0 = vrot.slane %v30_v63, 4 }
  0xe1   :  { %v262_v54 = vadd.f32 %v261_v52, %v247_v53  ;;  %v32_v1 = vadd.f32 %v31_v0, %v30_v63 }
  0xe2   :  { %v283_v6 = vpop.xlane.xlu0 %282 }
  0xe3   :  { %v263_v55 = vrot.slane %v262_v54, 4  ;;  %v33_v18 = vrot.slane %v32_v1, 2  ;;  %v284_v8 = vrot.slane %v283_v6, 4 }
  0xe5   :  { %v264_v56 = vadd.f32 %v263_v55, %v262_v54  ;;  %v34_v2 = vadd.f32 %v33_v18, %v32_v1  ;;  %v285_v9 = vadd.f32 %v284_v8, %v283_v6 }
  0xe7   :  { %v265_v57 = vrot.slane %v264_v56, 2  ;;  %v35_v5 = vrot.slane %v34_v2, 1  ;;  %v286_v10 = vrot.slane %v285_v9, 2 }
  0xe9   :  { %v266_v58 = vadd.f32 %v265_v57, %v264_v56  ;;  %v36_v4 = vadd.f32 %v35_v5, %v34_v2  ;;  %v287_v14 = vadd.f32 %v286_v10, %v285_v9 }
  0xeb   :  { %v267_v59 = vrot.slane %v266_v58, 1  ;;  %304 = vpush %v36_v4  ;;  %v288_v16 = vrot.slane %v287_v14, 1 }
  0xed   :  { %v268_v61 = vadd.f32 %v267_v59, %v266_v58  ;;  %v289_v20 = vadd.f32 %v288_v16, %v287_v14 }
  0xef   :  { %v269_v62 = vmul.f32 %v268_v61, %v488_v60 }
  0xf1   :  { %v270_v7 = vsel %vm27_vm0, %v269_v62, 0.0 }
  0xf2   :  { %271 = vadd.xlane.f32.xlu1 %v270_v7 }
 0x11c   :  { %s305_s3 = spop %304 }
 0x11d   :  { %v38_v23 = vstv %s305_s3 }
 0x11e   :  { %v40_v26 = vmul.f32 0.0078125, %v38_v23 }
 0x17b   :  { %v272_v11 = vpop.xlane.xlu1 %271 }
 0x17c   :  { %v273_v12 = vrot.slane %v272_v11, 4 }
 0x17e   :  { %v274_v13 = vadd.f32 %v273_v12, %v272_v11 }
 0x180   :  { %v275_v60 = vrot.slane %v274_v13, 2 }
 0x182   :  { %v276_v15 = vadd.f32 %v275_v60, %v274_v13 }
 0x184   :  { %v277_v17 = vrot.slane %v276_v15, 1 }
 0x186   :  { %v278_v19 = vadd.f32 %v277_v17, %v276_v15 }
 0x188   :  { %306 = vpush %v278_v19 }
 0x189   :  { %308 = vpush %v289_v20 }
 0x1b9   :  { %s307_s20 = spop %306 }
 0x1ba   :  { %v280_v21 = vstv %s307_s20  ;;  %s309_s21 = spop %308 }
 0x1bb   :  { %v291_v22 = vstv %s309_s21 }
 0x1bc   :  { %v292_v24 = vmul.f32 %v291_v22, %v280_v21 }
 0x1be   :  { %v294_v25 = vmul.f32 4.7683716e-07, %v292_v24 }
 0x1c0   :  { %v297_v27 = vsel %vm296_vm1, %v294_v25, 0.0 }
 0x1c1   :  { %v298_v28 = vsel %vm295_vm2, %v40_v26, %v297_v27 }
 0x1c2   :  { %299 = vst [vmem:[%s537_s4] sm:$0xff] %v298_v28 }

</bundles_post_ra>
